<compile_context>
chip_gen: v7x
topology: tpu7x:2x2x1
jax: 0.10.0
libtpu: 0.0.40
codegen_flags: <defaults>
</compile_context>

<pallas_src>
import jax
import jax.numpy as jnp
from jax.experimental import pallas as pl
from jax.experimental.pallas import tpu as pltpu


def _round_up(x, m):
    return (x + m - 1) // m * m


def _pad_to(a, axis, target):
    pad = target - a.shape[axis]
    if pad == 0:
        return a
    widths = [(0, 0)] * a.ndim
    widths[axis] = (0, pad)
    return jnp.pad(a, widths)


def _vmem_capacity_bytes():
    try:
        return int(pltpu.get_tpu_info().vmem_capacity_bytes)
    except Exception:
        return 64 << 20  # conservative fallback: fits every generation


# ----------------------------------------------------------------------------
# Kernel
# ----------------------------------------------------------------------------
def mlp_kernel(x_ref, w1a_ref, w1b_ref, b1a_ref, b1b_ref, w2_ref, b2_ref,
               o_ref, acc_ref):
    """Grid = (row tiles, hidden-dim chunks). acc_ref: (tm, dp) f32 scratch."""
    k = pl.program_id(1)

    @pl.when(k == 0)
    def _init():
        acc_ref[...] = jnp.zeros_like(acc_ref)

    x = x_ref[...]  # (tm, dim_in) bf16

    # Two lane-dense dots (hidden halves were split/padded outside the kernel).
    x1 = jnp.dot(x, w1a_ref[...], preferred_element_type=jnp.float32) + b1a_ref[...]
    x2 = jnp.dot(x, w1b_ref[...], preferred_element_type=jnp.float32) + b1b_ref[...]

    # Gated activation in f32 (sigmoid -> EUP slot, muls -> VPU; free vs MXU).
    g = x1 * (x2 * jax.nn.sigmoid(x2))

    # Accumulate the second linear over hidden-dim chunks.
    acc_ref[...] += jnp.dot(g.astype(jnp.bfloat16), w2_ref[...],
                            preferred_element_type=jnp.float32)

    @pl.when(k == pl.num_programs(1) - 1)
    def _finalize():
        o_ref[...] = (acc_ref[...] + b2_ref[...]).astype(o_ref.dtype)


# ----------------------------------------------------------------------------
# pallas_call builder
# ----------------------------------------------------------------------------
def _vmem_limit_bytes(tm, dim_in, tk, dp, nk, out_itemsize, single_buffer_weights):
    nbuf_w = 1 if (single_buffer_weights and nk == 1) else 2
    w_bytes = nbuf_w * (2 * dim_in * tk * 2 + tk * dp * 2)     # w1a+w1b+w2 (bf16)
    b_bytes = nbuf_w * (2 * tk * 4) + dp * 4                   # b1a+b1b, b2 (f32)
    x_bytes = 2 * tm * dim_in * 2                              # x tile, 2 bufs
    o_bytes = 2 * tm * dp * out_itemsize                       # out tile, 2 bufs
    acc_bytes = tm * dp * 4                                    # f32 accumulator
    inter_bytes = 3 * tm * tk * 4 + tm * tk * 2                # x1, x2, g (+bf16 g)
    need = w_bytes + b_bytes + x_bytes + o_bytes + acc_bytes + inter_bytes
    cap = _vmem_capacity_bytes()
    return int(min(0.85 * cap, max(32 << 20, 1.5 * need + (4 << 20))))


def _mlp_pallas(x2d, w1a, w1b, b1a, b1b, w2, b2, *, tm, tk, out_dtype,
                single_buffer_weights):
    """x2d: (M_pad, dim_in) bf16; w1a/w1b: (dim_in, hp) bf16; w2: (hp, dp) bf16;
    biases f32 with shape (1, N)."""
    M, dim_in = x2d.shape
    hp = w1a.shape[1]
    dp = w2.shape[1]
    assert M % tm == 0 and hp % tk == 0
    nk = hp // tk
    weights_invariant = (nk == 1)

    def spec(shape, imap, invariant):
        if invariant and single_buffer_weights:
            # Grid-invariant operand: one pipeline buffer is enough.
            return pl.BlockSpec(shape, imap, pipeline_mode=pl.Buffered(1))
        return pl.BlockSpec(shape, imap)

    in_specs = [
        pl.BlockSpec((tm, dim_in), lambda i, k: (i, 0)),                 # x
        spec((dim_in, tk), lambda i, k: (0, k), weights_invariant),      # w1a
        spec((dim_in, tk), lambda i, k: (0, k), weights_invariant),      # w1b
        spec((1, tk),      lambda i, k: (0, k), weights_invariant),      # b1a
        spec((1, tk),      lambda i, k: (0, k), weights_invariant),      # b1b
        spec((tk, dp),     lambda i, k: (k, 0), weights_invariant),      # w2
        spec((1, dp),      lambda i, k: (0, 0), True),                   # b2 (always inv.)
    ]

    vmem_limit = _vmem_limit_bytes(tm, dim_in, tk, dp, nk,
                                   jnp.dtype(out_dtype).itemsize,
                                   single_buffer_weights)

    return pl.pallas_call(
        mlp_kernel,
        out_shape=jax.ShapeDtypeStruct((M, dp), out_dtype),
        grid_spec=pltpu.PrefetchScalarGridSpec(
            num_scalar_prefetch=0,
            grid=(M // tm, nk),
            in_specs=in_specs,
            out_specs=pl.BlockSpec((tm, dp), lambda i, k: (i, 0)),
            scratch_shapes=[pltpu.VMEM((tm, dp), jnp.float32)],
        ),
        compiler_params=pltpu.CompilerParams(
            dimension_semantics=("parallel", "arbitrary"),
            vmem_limit_bytes=vmem_limit,
        ),
    )(x2d, w1a, w1b, b1a, b1b, w2, b2)


# ----------------------------------------------------------------------------
# Parameter prep (hoisted out of the per-call path) and forward wrapper
# ----------------------------------------------------------------------------
def prepare_params(params):
    """Split / pad / bf16-cast the MLP weights ONCE; returns a prepared dict."""
    w1_t, b1, w2_t, b2 = params
    dim_in, hidden = w1_t.shape
    assert hidden % 2 == 0, "hidden_dim must be even (chunk(2))"
    half = hidden // 2
    dim_out = w2_t.shape[1]
    assert w2_t.shape[0] == half

    hp = _round_up(half, 128)
    # Hidden-dim reduction tile: stream weight slabs when half is large so VMEM
    # stays bounded (v7x: 64 MiB); a single K step for small models.
    if hp > 1024:
        tk = 512
        hp = _round_up(hp, tk)
    else:
        tk = hp
    dp = _round_up(dim_out, 128)

    w1a = _pad_to(w1_t[:, :half], 1, hp).astype(jnp.bfloat16)
    w1b = _pad_to(w1_t[:, half:], 1, hp).astype(jnp.bfloat16)
    b1a = _pad_to(b1[:half].reshape(1, half), 1, hp).astype(jnp.float32)
    b1b = _pad_to(b1[half:].reshape(1, half), 1, hp).astype(jnp.float32)
    w2p = _pad_to(_pad_to(w2_t, 0, hp), 1, dp).astype(jnp.bfloat16)
    b2p = _pad_to(b2.reshape(1, dim_out), 1, dp).astype(jnp.float32)

    return dict(w1a=w1a, w1b=w1b, b1a=b1a, b1b=b1b, w2=w2p, b2=b2p,
                dim_in=dim_in, dim_out=dim_out, hp=hp, dp=dp, tk=tk)


def _choose_tm(M, tm_target):
    if M >= 512:
        tm = min(_round_up(tm_target, 256), _round_up(max(M // 2, 256), 256))
    else:
        tm = _round_up(min(tm_target, M), 16)
    # Guarantee >= 2 row steps where possible so v7x's 2 TensorCores both work.
    if _round_up(M, tm) // tm == 1 and tm >= 32:
        tm = _round_up(tm // 2, 16)
    return max(tm, 16)


_SINGLE_BUFFER_OK = None  # cache: does this jax build accept pl.Buffered(1)?


def mlp_forward(x, prepared, *, tm_target=512, out_dtype=None):
    """x: (..., dim_in) -> (..., dim_out). Padding / dtype plumbing lives here."""
    dim_in = prepared["dim_in"]
    dim_out = prepared["dim_out"]
    assert x.shape[-1] == dim_in
    out_dtype = out_dtype or x.dtype

    lead = x.shape[:-1]
    x2d = x.reshape(-1, dim_in)
    M = x2d.shape[0]

    tm = _choose_tm(M, tm_target)
    M_pad = _round_up(M, tm)
    x_pad = _pad_to(x2d, 0, M_pad).astype(jnp.bfloat16)

    args = (x_pad, prepared["w1a"], prepared["w1b"], prepared["b1a"],
            prepared["b1b"], prepared["w2"], prepared["b2"])
    kwargs = dict(tm=tm, tk=prepared["tk"], out_dtype=out_dtype)

    global _SINGLE_BUFFER_OK
    y = None
    if _SINGLE_BUFFER_OK is not False:
        try:
            y = _mlp_pallas(*args, single_buffer_weights=True, **kwargs)
            y = jax.block_until_ready(y)
            _SINGLE_BUFFER_OK = True
        except Exception:
            _SINGLE_BUFFER_OK = False
            y = None
    if y is None:
        y = _mlp_pallas(*args, single_buffer_weights=False, **kwargs)

    y = y[:M, :dim_out]
    return y.reshape(*lead, dim_out)


# ----------------------------------------------------------------------------
# Synthetic params + pure-JAX reference
# ----------------------------------------------------------------------------
def init_params(key, dim_in, dim_out, hidden_dim=None, dtype=jnp.float32):
    """nn.Linear-shaped params, already in (in, out) layout (i.e. transposed)."""
    hidden_dim = hidden_dim or 2 * dim_out
    half = hidden_dim // 2
    k1, k2, k3, k4 = jax.random.split(key, 4)
    s1 = 1.0 / (dim_in ** 0.5)
    s2 = 1.0 / (half ** 0.5)
    w1_t = jax.random.uniform(k1, (dim_in, hidden_dim), dtype, -s1, s1)
    b1 = jax.random.uniform(k2, (hidden_dim,), dtype, -s1, s1)
    w2_t = jax.random.uniform(k3, (half, dim_out), dtype, -s2, s2)
    b2 = jax.random.uniform(k4, (dim_out,), dtype, -s2, s2)
    return w1_t, b1, w2_t, b2


def mlp_reference(x, params):
    w1_t, b1, w2_t, b2 = params
    h = x @ w1_t + b1
    half = h.shape[-1] // 2
    x1, x2 = h[..., :half], h[..., half:]
    return (x1 * (x2 * jax.nn.sigmoid(x2))) @ w2_t + b2


if __name__ == "__main__":
    key = jax.random.PRNGKey(0)
    kx, kp, kx2, kp2 = jax.random.split(key, 4)

    # --- small case (module defaults: hidden_dim = 2 * dim_out) ----------------
    batch, seq = 2, 8
    dim_in, dim_out = 32, 32
    x = jax.random.normal(kx, (batch, seq, dim_in), dtype=jnp.float32)
    params = init_params(kp, dim_in, dim_out)
    prepared = prepare_params(params)

    y = mlp_forward(x, prepared)
    y = jax.block_until_ready(y)
    y_ref = mlp_reference(x, params)
    assert y.shape == (batch, seq, dim_out)
    assert jnp.allclose(y, y_ref, atol=2e-2, rtol=2e-2), "mismatch (small case)"

    # --- larger case exercising the hidden-dim K-tiling path -------------------
    dim_in2, dim_out2, hidden2 = 64, 48, 2560       # half=1280 -> hp=1536, tk=512
    x2 = jax.random.normal(kx2, (3, 128, dim_in2), dtype=jnp.float32)
    params2 = init_params(kp2, dim_in2, dim_out2, hidden_dim=hidden2)
    prepared2 = prepare_params(params2)

    y2 = mlp_forward(x2, prepared2)
    y2 = jax.block_until_ready(y2)
    y2_ref = mlp_reference(x2, params2)
    assert y2.shape == (3, 128, dim_out2)
    assert jnp.allclose(y2, y2_ref, atol=3e-2, rtol=3e-2), "mismatch (K-tiled case)"

    print("KERNEL_OK")
</pallas_src>

<mosaic_0001>
module attributes {stable_mosaic.version = 11 : i64} {
  func.func @mlp_kernel(%arg0: i32, %arg1: i32, %arg2: memref<16x32xbf16, #tpu.memory_space<vmem>>, %arg3: memref<32x128xbf16, #tpu.memory_space<vmem>>, %arg4: memref<32x128xbf16, #tpu.memory_space<vmem>>, %arg5: memref<1x128xf32, #tpu.memory_space<vmem>>, %arg6: memref<1x128xf32, #tpu.memory_space<vmem>>, %arg7: memref<128x128xbf16, #tpu.memory_space<vmem>>, %arg8: memref<1x128xf32, #tpu.memory_space<vmem>>, %arg9: memref<16x128xf32, #tpu.memory_space<vmem>>, %arg10: memref<16x128xf32, #tpu.memory_space<vmem>>) attributes {dimension_semantics = [#tpu.dimension_semantics<parallel>, #tpu.dimension_semantics<arbitrary>], iteration_bounds = array<i64: 1, 1>, scalar_prefetch = 0 : i64, scratch_operands = 1 : i64, tpu.core_type = #tpu.core_type<tc>, window_params = [{transform_indices = @transform_0, window_bounds = array<i64: 16, 32>}, {pipeline_mode = #tpu.pipeline_mode<synchronous>, transform_indices = @transform_1, window_bounds = array<i64: 32, 128>}, {pipeline_mode = #tpu.pipeline_mode<synchronous>, transform_indices = @transform_2, window_bounds = array<i64: 32, 128>}, {pipeline_mode = #tpu.pipeline_mode<synchronous>, transform_indices = @transform_3, window_bounds = array<i64: 1, 128>}, {pipeline_mode = #tpu.pipeline_mode<synchronous>, transform_indices = @transform_4, window_bounds = array<i64: 1, 128>}, {pipeline_mode = #tpu.pipeline_mode<synchronous>, transform_indices = @transform_5, window_bounds = array<i64: 128, 128>}, {pipeline_mode = #tpu.pipeline_mode<synchronous>, transform_indices = @transform_6, window_bounds = array<i64: 1, 128>}, {transform_indices = @transform_7, window_bounds = array<i64: 16, 128>}]} {
    %c0_i32 = arith.constant 0 : i32
    %0 = arith.cmpi eq, %arg1, %c0_i32 : i32
    %1 = arith.extui %0 : i1 to i32
    %c0_i32_0 = arith.constant 0 : i32
    %2 = arith.cmpi ne, %1, %c0_i32_0 : i32
    scf.if %2 {
      %cst_21 = arith.constant 0.000000e+00 : f32
      %30 = vector.broadcast %cst_21 : f32 to vector<16x128xf32>
      %c0_22 = arith.constant 0 : index
      %c0_23 = arith.constant 0 : index
      %31 = vector.load %arg10[%c0_22, %c0_23] : memref<16x128xf32, #tpu.memory_space<vmem>>, vector<16x128xf32>
      tpu.vector_store %arg10[%c0_22, %c0_23], %30 {strides = array<i32>} : memref<16x128xf32, #tpu.memory_space<vmem>>, vector<16x128xf32>,
    } else {
    }
    %c0 = arith.constant 0 : index
    %c0_1 = arith.constant 0 : index
    %3 = vector.load %arg2[%c0, %c0_1] : memref<16x32xbf16, #tpu.memory_space<vmem>>, vector<16x32xbf16>
    %c0_2 = arith.constant 0 : index
    %c0_3 = arith.constant 0 : index
    %4 = vector.load %arg3[%c0_2, %c0_3] : memref<32x128xbf16, #tpu.memory_space<vmem>>, vector<32x128xbf16>
    %cst = arith.constant dense<0.000000e+00> : vector<16x128xf32>
    %5 = tpu.matmul %3, %4, %cst {dimension_numbers = #tpu.dot_dimension_numbers<[1], [0], [0], [1], [0, 0, 1, 1], [], []>} : vector<16x32xbf16>, vector<32x128xbf16>, vector<16x128xf32> -> vector<16x128xf32>
    %c0_4 = arith.constant 0 : index
    %c0_5 = arith.constant 0 : index
    %6 = vector.load %arg5[%c0_4, %c0_5] : memref<1x128xf32, #tpu.memory_space<vmem>>, vector<1x128xf32>
    %7 = vector.broadcast %6 : vector<1x128xf32> to vector<16x128xf32>
    %8 = arith.addf %5, %7 : vector<16x128xf32>
    %c0_6 = arith.constant 0 : index
    %c0_7 = arith.constant 0 : index
    %9 = vector.load %arg4[%c0_6, %c0_7] : memref<32x128xbf16, #tpu.memory_space<vmem>>, vector<32x128xbf16>
    %cst_8 = arith.constant dense<0.000000e+00> : vector<16x128xf32>
    %10 = tpu.matmul %3, %9, %cst_8 {dimension_numbers = #tpu.dot_dimension_numbers<[1], [0], [0], [1], [0, 0, 1, 1], [], []>} : vector<16x32xbf16>, vector<32x128xbf16>, vector<16x128xf32> -> vector<16x128xf32>
    %c0_9 = arith.constant 0 : index
    %c0_10 = arith.constant 0 : index
    %11 = vector.load %arg6[%c0_9, %c0_10] : memref<1x128xf32, #tpu.memory_space<vmem>>, vector<1x128xf32>
    %12 = vector.broadcast %11 : vector<1x128xf32> to vector<16x128xf32>
    %13 = arith.addf %10, %12 : vector<16x128xf32>
    %14 = arith.negf %13 : vector<16x128xf32>
    %15 = math.exp %14 : vector<16x128xf32>
    %cst_11 = arith.constant 1.000000e+00 : f32
    %16 = vector.broadcast %cst_11 : f32 to vector<16x128xf32>
    %17 = arith.addf %16, %15 : vector<16x128xf32>
    %18 = arith.divf %16, %17 : vector<16x128xf32>
    %19 = arith.mulf %13, %18 : vector<16x128xf32>
    %20 = arith.mulf %8, %19 : vector<16x128xf32>
    %c0_12 = arith.constant 0 : index
    %c0_13 = arith.constant 0 : index
    %21 = vector.load %arg10[%c0_12, %c0_13] : memref<16x128xf32, #tpu.memory_space<vmem>>, vector<16x128xf32>
    %22 = arith.truncf %20 : vector<16x128xf32> to vector<16x128xbf16>
    %c0_14 = arith.constant 0 : index
    %c0_15 = arith.constant 0 : index
    %23 = vector.load %arg7[%c0_14, %c0_15] : memref<128x128xbf16, #tpu.memory_space<vmem>>, vector<128x128xbf16>
    %cst_16 = arith.constant dense<0.000000e+00> : vector<16x128xf32>
    %24 = tpu.matmul %22, %23, %cst_16 {dimension_numbers = #tpu.dot_dimension_numbers<[1], [0], [0], [1], [0, 0, 1, 1], [], []>} : vector<16x128xbf16>, vector<128x128xbf16>, vector<16x128xf32> -> vector<16x128xf32>
    %25 = arith.addf %21, %24 : vector<16x128xf32>
    %c0_17 = arith.constant 0 : index
    %c0_18 = arith.constant 0 : index
    %26 = vector.load %arg10[%c0_17, %c0_18] : memref<16x128xf32, #tpu.memory_space<vmem>>, vector<16x128xf32>
    tpu.vector_store %arg10[%c0_17, %c0_18], %25 {strides = array<i32>} : memref<16x128xf32, #tpu.memory_space<vmem>>, vector<16x128xf32>,
    %c0_i32_19 = arith.constant 0 : i32
    %27 = arith.cmpi eq, %arg1, %c0_i32_19 : i32
    %28 = arith.extui %27 : i1 to i32
    %c0_i32_20 = arith.constant 0 : i32
    %29 = arith.cmpi ne, %28, %c0_i32_20 : i32
    scf.if %29 {
      %c0_21 = arith.constant 0 : index
      %c0_22 = arith.constant 0 : index
      %30 = vector.load %arg10[%c0_21, %c0_22] : memref<16x128xf32, #tpu.memory_space<vmem>>, vector<16x128xf32>
      %c0_23 = arith.constant 0 : index
      %c0_24 = arith.constant 0 : index
      %31 = vector.load %arg8[%c0_23, %c0_24] : memref<1x128xf32, #tpu.memory_space<vmem>>, vector<1x128xf32>
      %32 = vector.broadcast %31 : vector<1x128xf32> to vector<16x128xf32>
      %33 = arith.addf %30, %32 : vector<16x128xf32>
      %c0_25 = arith.constant 0 : index
      %c0_26 = arith.constant 0 : index
      %34 = vector.load %arg9[%c0_25, %c0_26] : memref<16x128xf32, #tpu.memory_space<vmem>>, vector<16x128xf32>
      tpu.vector_store %arg9[%c0_25, %c0_26], %33 {strides = array<i32>} : memref<16x128xf32, #tpu.memory_space<vmem>>, vector<16x128xf32>,
    } else {
    }
    return
  }
  func.func @transform_0(%arg0: i32, %arg1: i32) -> (i32, i32) {
    %c0_i32 = arith.constant 0 : i32
    %c0_i32_0 = arith.constant 0 : i32
    return %arg0, %c0_i32 : i32, i32
  }
  func.func @transform_1(%arg0: i32, %arg1: i32) -> (i32, i32) {
    %c0_i32 = arith.constant 0 : i32
    %c0_i32_0 = arith.constant 0 : i32
    return %c0_i32, %arg1 : i32, i32
  }
  func.func @transform_2(%arg0: i32, %arg1: i32) -> (i32, i32) {
    %c0_i32 = arith.constant 0 : i32
    %c0_i32_0 = arith.constant 0 : i32
    return %c0_i32, %arg1 : i32, i32
  }
  func.func @transform_3(%arg0: i32, %arg1: i32) -> (i32, i32) {
    %c0_i32 = arith.constant 0 : i32
    %c0_i32_0 = arith.constant 0 : i32
    return %c0_i32, %arg1 : i32, i32
  }
  func.func @transform_4(%arg0: i32, %arg1: i32) -> (i32, i32) {
    %c0_i32 = arith.constant 0 : i32
    %c0_i32_0 = arith.constant 0 : i32
    return %c0_i32, %arg1 : i32, i32
  }
  func.func @transform_5(%arg0: i32, %arg1: i32) -> (i32, i32) {
    %c0_i32 = arith.constant 0 : i32
    %c0_i32_0 = arith.constant 0 : i32
    return %arg1, %c0_i32 : i32, i32
  }
  func.func @transform_6(%arg0: i32, %arg1: i32) -> (i32, i32) {
    %c0_i32 = arith.constant 0 : i32
    %c0_i32_0 = arith.constant 0 : i32
    %c0_i32_1 = arith.constant 0 : i32
    return %c0_i32, %c0_i32_0 : i32, i32
  }
  func.func @transform_7(%arg0: i32, %arg1: i32) -> (i32, i32) {
    %c0_i32 = arith.constant 0 : i32
    %c0_i32_0 = arith.constant 0 : i32
    return %arg0, %c0_i32 : i32, i32
  }
}

module attributes {stable_mosaic.version = 11 : i64} {
  func.func @mlp_kernel(%arg0: i32, %arg1: i32, %arg2: memref<16x32xbf16, #tpu.memory_space<vmem>>, %arg3: memref<32x128xbf16, #tpu.memory_space<vmem>>, %arg4: memref<32x128xbf16, #tpu.memory_space<vmem>>, %arg5: memref<1x128xf32, #tpu.memory_space<vmem>>, %arg6: memref<1x128xf32, #tpu.memory_space<vmem>>, %arg7: memref<128x128xbf16, #tpu.memory_space<vmem>>, %arg8: memref<1x128xf32, #tpu.memory_space<vmem>>, %arg9: memref<16x128xf32, #tpu.memory_space<vmem>>, %arg10: memref<16x128xf32, #tpu.memory_space<vmem>>) attributes {dimension_semantics = [#tpu.dimension_semantics<parallel>, #tpu.dimension_semantics<arbitrary>], iteration_bounds = array<i64: 1, 1>, scalar_prefetch = 0 : i64, scratch_operands = 1 : i64, tpu.core_type = #tpu.core_type<tc>, window_params = [{transform_indices = @transform_0, window_bounds = array<i64: 16, 32>}, {transform_indices = @transform_1, window_bounds = array<i64: 32, 128>}, {transform_indices = @transform_2, window_bounds = array<i64: 32, 128>}, {transform_indices = @transform_3, window_bounds = array<i64: 1, 128>}, {transform_indices = @transform_4, window_bounds = array<i64: 1, 128>}, {transform_indices = @transform_5, window_bounds = array<i64: 128, 128>}, {pipeline_mode = #tpu.pipeline_mode<synchronous>, transform_indices = @transform_6, window_bounds = array<i64: 1, 128>}, {transform_indices = @transform_7, window_bounds = array<i64: 16, 128>}]} {
    %c0_i32 = arith.constant 0 : i32
    %0 = arith.cmpi eq, %arg1, %c0_i32 : i32
    %1 = arith.extui %0 : i1 to i32
    %c0_i32_0 = arith.constant 0 : i32
    %2 = arith.cmpi ne, %1, %c0_i32_0 : i32
    scf.if %2 {
      %cst_21 = arith.constant 0.000000e+00 : f32
      %30 = vector.broadcast %cst_21 : f32 to vector<16x128xf32>
      %c0_22 = arith.constant 0 : index
      %c0_23 = arith.constant 0 : index
      %31 = vector.load %arg10[%c0_22, %c0_23] : memref<16x128xf32, #tpu.memory_space<vmem>>, vector<16x128xf32>
      tpu.vector_store %arg10[%c0_22, %c0_23], %30 {strides = array<i32>} : memref<16x128xf32, #tpu.memory_space<vmem>>, vector<16x128xf32>,
    } else {
    }
    %c0 = arith.constant 0 : index
    %c0_1 = arith.constant 0 : index
    %3 = vector.load %arg2[%c0, %c0_1] : memref<16x32xbf16, #tpu.memory_space<vmem>>, vector<16x32xbf16>
    %c0_2 = arith.constant 0 : index
    %c0_3 = arith.constant 0 : index
    %4 = vector.load %arg3[%c0_2, %c0_3] : memref<32x128xbf16, #tpu.memory_space<vmem>>, vector<32x128xbf16>
    %cst = arith.constant dense<0.000000e+00> : vector<16x128xf32>
    %5 = tpu.matmul %3, %4, %cst {dimension_numbers = #tpu.dot_dimension_numbers<[1], [0], [0], [1], [0, 0, 1, 1], [], []>} : vector<16x32xbf16>, vector<32x128xbf16>, vector<16x128xf32> -> vector<16x128xf32>
    %c0_4 = arith.constant 0 : index
    %c0_5 = arith.constant 0 : index
    %6 = vector.load %arg5[%c0_4, %c0_5] : memref<1x128xf32, #tpu.memory_space<vmem>>, vector<1x128xf32>
    %7 = vector.broadcast %6 : vector<1x128xf32> to vector<16x128xf32>
    %8 = arith.addf %5, %7 : vector<16x128xf32>
    %c0_6 = arith.constant 0 : index
    %c0_7 = arith.constant 0 : index
    %9 = vector.load %arg4[%c0_6, %c0_7] : memref<32x128xbf16, #tpu.memory_space<vmem>>, vector<32x128xbf16>
    %cst_8 = arith.constant dense<0.000000e+00> : vector<16x128xf32>
    %10 = tpu.matmul %3, %9, %cst_8 {dimension_numbers = #tpu.dot_dimension_numbers<[1], [0], [0], [1], [0, 0, 1, 1], [], []>} : vector<16x32xbf16>, vector<32x128xbf16>, vector<16x128xf32> -> vector<16x128xf32>
    %c0_9 = arith.constant 0 : index
    %c0_10 = arith.constant 0 : index
    %11 = vector.load %arg6[%c0_9, %c0_10] : memref<1x128xf32, #tpu.memory_space<vmem>>, vector<1x128xf32>
    %12 = vector.broadcast %11 : vector<1x128xf32> to vector<16x128xf32>
    %13 = arith.addf %10, %12 : vector<16x128xf32>
    %14 = arith.negf %13 : vector<16x128xf32>
    %15 = math.exp %14 : vector<16x128xf32>
    %cst_11 = arith.constant 1.000000e+00 : f32
    %16 = vector.broadcast %cst_11 : f32 to vector<16x128xf32>
    %17 = arith.addf %16, %15 : vector<16x128xf32>
    %18 = arith.divf %16, %17 : vector<16x128xf32>
    %19 = arith.mulf %13, %18 : vector<16x128xf32>
    %20 = arith.mulf %8, %19 : vector<16x128xf32>
    %c0_12 = arith.constant 0 : index
    %c0_13 = arith.constant 0 : index
    %21 = vector.load %arg10[%c0_12, %c0_13] : memref<16x128xf32, #tpu.memory_space<vmem>>, vector<16x128xf32>
    %22 = arith.truncf %20 : vector<16x128xf32> to vector<16x128xbf16>
    %c0_14 = arith.constant 0 : index
    %c0_15 = arith.constant 0 : index
    %23 = vector.load %arg7[%c0_14, %c0_15] : memref<128x128xbf16, #tpu.memory_space<vmem>>, vector<128x128xbf16>
    %cst_16 = arith.constant dense<0.000000e+00> : vector<16x128xf32>
    %24 = tpu.matmul %22, %23, %cst_16 {dimension_numbers = #tpu.dot_dimension_numbers<[1], [0], [0], [1], [0, 0, 1, 1], [], []>} : vector<16x128xbf16>, vector<128x128xbf16>, vector<16x128xf32> -> vector<16x128xf32>
    %25 = arith.addf %21, %24 : vector<16x128xf32>
    %c0_17 = arith.constant 0 : index
    %c0_18 = arith.constant 0 : index
    %26 = vector.load %arg10[%c0_17, %c0_18] : memref<16x128xf32, #tpu.memory_space<vmem>>, vector<16x128xf32>
    tpu.vector_store %arg10[%c0_17, %c0_18], %25 {strides = array<i32>} : memref<16x128xf32, #tpu.memory_space<vmem>>, vector<16x128xf32>,
    %c0_i32_19 = arith.constant 0 : i32
    %27 = arith.cmpi eq, %arg1, %c0_i32_19 : i32
    %28 = arith.extui %27 : i1 to i32
    %c0_i32_20 = arith.constant 0 : i32
    %29 = arith.cmpi ne, %28, %c0_i32_20 : i32
    scf.if %29 {
      %c0_21 = arith.constant 0 : index
      %c0_22 = arith.constant 0 : index
      %30 = vector.load %arg10[%c0_21, %c0_22] : memref<16x128xf32, #tpu.memory_space<vmem>>, vector<16x128xf32>
      %c0_23 = arith.constant 0 : index
      %c0_24 = arith.constant 0 : index
      %31 = vector.load %arg8[%c0_23, %c0_24] : memref<1x128xf32, #tpu.memory_space<vmem>>, vector<1x128xf32>
      %32 = vector.broadcast %31 : vector<1x128xf32> to vector<16x128xf32>
      %33 = arith.addf %30, %32 : vector<16x128xf32>
      %c0_25 = arith.constant 0 : index
      %c0_26 = arith.constant 0 : index
      %34 = vector.load %arg9[%c0_25, %c0_26] : memref<16x128xf32, #tpu.memory_space<vmem>>, vector<16x128xf32>
      tpu.vector_store %arg9[%c0_25, %c0_26], %33 {strides = array<i32>} : memref<16x128xf32, #tpu.memory_space<vmem>>, vector<16x128xf32>,
    } else {
    }
    return
  }
  func.func @transform_0(%arg0: i32, %arg1: i32) -> (i32, i32) {
    %c0_i32 = arith.constant 0 : i32
    %c0_i32_0 = arith.constant 0 : i32
    return %arg0, %c0_i32 : i32, i32
  }
  func.func @transform_1(%arg0: i32, %arg1: i32) -> (i32, i32) {
    %c0_i32 = arith.constant 0 : i32
    %c0_i32_0 = arith.constant 0 : i32
    return %c0_i32, %arg1 : i32, i32
  }
  func.func @transform_2(%arg0: i32, %arg1: i32) -> (i32, i32) {
    %c0_i32 = arith.constant 0 : i32
    %c0_i32_0 = arith.constant 0 : i32
    return %c0_i32, %arg1 : i32, i32
  }
  func.func @transform_3(%arg0: i32, %arg1: i32) -> (i32, i32) {
    %c0_i32 = arith.constant 0 : i32
    %c0_i32_0 = arith.constant 0 : i32
    return %c0_i32, %arg1 : i32, i32
  }
  func.func @transform_4(%arg0: i32, %arg1: i32) -> (i32, i32) {
    %c0_i32 = arith.constant 0 : i32
    %c0_i32_0 = arith.constant 0 : i32
    return %c0_i32, %arg1 : i32, i32
  }
  func.func @transform_5(%arg0: i32, %arg1: i32) -> (i32, i32) {
    %c0_i32 = arith.constant 0 : i32
    %c0_i32_0 = arith.constant 0 : i32
    return %arg1, %c0_i32 : i32, i32
  }
  func.func @transform_6(%arg0: i32, %arg1: i32) -> (i32, i32) {
    %c0_i32 = arith.constant 0 : i32
    %c0_i32_0 = arith.constant 0 : i32
    %c0_i32_1 = arith.constant 0 : i32
    return %c0_i32, %c0_i32_0 : i32, i32
  }
  func.func @transform_7(%arg0: i32, %arg1: i32) -> (i32, i32) {
    %c0_i32 = arith.constant 0 : i32
    %c0_i32_0 = arith.constant 0 : i32
    return %arg0, %c0_i32 : i32, i32
  }
}

</mosaic_0001>

<bundles_post_ra>
// kernel: tpu_custom_call.1
= control target key start
LH: loop header
LB: loop body
LE: loop exit
PB: predicated region body
PF: predicated region fallthrough
CT: control target
= control target key end

     0   :  { %12 = vsyncpa [#allocation4], 0  ;;  %s761_s0 = inlined_call_operand.hbm [shape: bf16[16,32], index: 0, kind: input, shape index: {}]   ;;  %s762_s1 = inlined_call_operand.hbm [shape: bf16[32,128], index: 1, kind: input, shape index: {}]   ;;  %s763_s2 = inlined_call_operand.hbm [shape: bf16[32,128], index: 2, kind: input, shape index: {}]   ;;  %s764_s3 = inlined_call_operand.vmem [shape: f32[1,128], index: 3, kind: input, shape index: {}]   ;;  %s765_s4 = inlined_call_operand.vmem [shape: f32[1,128], index: 4, kind: input, shape index: {}]   ;;  %s766_s5 = inlined_call_operand.hbm [shape: bf16[128,128], index: 5, kind: input, shape index: {}]   ;;  %s767_s6 = inlined_call_operand.vmem [shape: f32[1,128], index: 6, kind: input, shape index: {}]   ;;  %s768_s7 = inlined_call_operand.hbm [shape: f32[16,128], index: 7, kind: output, shape index: {}]  }
   0x1   :  { %13 = vsyncpa [#allocation7], 0 }
   0x2   :  { %14 = vsyncpa [#allocation10], 0 }
   0x3   :  { %15 = vsyncpa [#allocation5], 0  ;;  %s612_s24 = smov [#allocation6]   ;;  %s613_s26 = smov [#allocation3]  }
   0x4   :  { %s33_s25 = sshll.u32 %s612_s24, 4  ;;  %s21_s27 = sshll.u32 %s613_s26, 4  ;;  %s34_s25 = int_to_ptr.vmem [resolvable:$true] %s33_s25  ;;  %s663_s27 = int_to_ptr.vmem [resolvable:$true] %s21_s27 }
   0x5   :  { %s494_s30 = scalar_lea.hbm %s762_s1, 256 }
   0x6   :  { %p495_p0 = scmp.ne.s32.totalorder %s762_s1, %s494_s30  ;;  %p498_p1 = scmp.lt.u32.totalorder %s494_s30, %s762_s1 }
   0x8   :  { %p500_p2 = pnand %p498_p1, %p495_p0 }
   0xa   :  { %503 = shalt.err (!%p500_p2)
}
   0xb   :  { %s504_s12 = scalar_lea.vmem %s34_s25, 256  ;;  %p509_p4 = scmp.lt.s32.totalorder %s34_s25, %s34_s25 }
   0xc   :  { %p505_p3 = scmp.ne.s32.totalorder %s34_s25, %s504_s12  ;;  %p510_p5 = scmp.lt.s32.totalorder %s504_s12, %s504_s12 }
   0xe   :  { %p511_p6 = por %p510_p5, %p509_p4 }
  0x10   :  { %p512_p7 = pnand %p511_p6, %p505_p3 }
  0x12   :  { %515 = shalt.err (!%p512_p7)
}
  0x13   :  { %s614_s13 = smov 64   ;;  %s615_s14 = smov 4  }
  0x14   :  { %39 = dma.hbm_to_vmem [thread:$0]  %s762_s1, 256, %s34_s25, [#allocation7], %s614_s13, %s614_s13, %s615_s14  }
  0x15   :  { %s516_s19 = scalar_lea.hbm %s761_s0, 128 }
  0x16   :  { %p517_p8 = scmp.ne.s32.totalorder %s761_s0, %s516_s19  ;;  %p520_p9 = scmp.lt.u32.totalorder %s516_s19, %s761_s0 }
  0x18   :  { %p522_p10 = pnand %p520_p9, %p517_p8 }
  0x1a   :  { %525 = shalt.err (!%p522_p10)
}
  0x1b   :  { %s526_s24 = scalar_lea.vmem %s663_s27, 128  ;;  %p531_p12 = scmp.lt.s32.totalorder %s663_s27, %s663_s27 }
  0x1c   :  { %p527_p11 = scmp.ne.s32.totalorder %s663_s27, %s526_s24  ;;  %p532_p13 = scmp.lt.s32.totalorder %s526_s24, %s526_s24 }
  0x1e   :  { %p533_p0 = por %p532_p13, %p531_p12 }
  0x20   :  { %p534_p1 = pnand %p533_p0, %p527_p11 }
  0x22   :  { %537 = shalt.err (!%p534_p1)
}
  0x23   :  { %27 = dma.hbm_to_vmem [thread:$0]  %s761_s0, 128, %s663_s27, [#allocation4], %s614_s13, %s614_s13, %s615_s14  }
  0x24   :  { %s616_s26 = smov [#allocation8]   ;;  %s617_s29 = smov [#allocation9]  }
  0x25   :  { %s45_s28 = sshll.u32 %s616_s26, 4  ;;  %s61_s30 = sshll.u32 %s617_s29, 4  ;;  %s46_s28 = int_to_ptr.vmem [resolvable:$true] %s45_s28  ;;  %s700_s30 = int_to_ptr.vmem [resolvable:$true] %s61_s30 }
  0x26   :  { %s538_s10 = scalar_lea.hbm %s763_s2, 256 }
  0x27   :  { %p539_p2 = scmp.ne.s32.totalorder %s763_s2, %s538_s10  ;;  %p542_p3 = scmp.lt.u32.totalorder %s538_s10, %s763_s2 }
  0x29   :  { %p544_p4 = pnand %p542_p3, %p539_p2 }
  0x2b   :  { %547 = shalt.err (!%p544_p4)
}
  0x2c   :  { %s548_s0 = scalar_lea.vmem %s46_s28, 256  ;;  %p553_p6 = scmp.lt.s32.totalorder %s46_s28, %s46_s28 }
  0x2d   :  { %p549_p5 = scmp.ne.s32.totalorder %s46_s28, %s548_s0  ;;  %p554_p7 = scmp.lt.s32.totalorder %s548_s0, %s548_s0 }
  0x2f   :  { %p555_p8 = por %p554_p7, %p553_p6 }
  0x31   :  { %p556_p9 = pnand %p555_p8, %p549_p5 }
  0x33   :  { %559 = shalt.err (!%p556_p9)
}
  0x34   :  { %51 = dma.hbm_to_vmem [thread:$0]  %s763_s2, 256, %s46_s28, [#allocation7], %s614_s13, %s614_s13, %s615_s14  }
  0x35   :  { %s560_s20 = scalar_lea.hbm %s766_s5, 1024 }
  0x36   :  { %p561_p10 = scmp.ne.s32.totalorder %s766_s5, %s560_s20  ;;  %p564_p11 = scmp.lt.u32.totalorder %s560_s20, %s766_s5 }
  0x38   :  { %p566_p12 = pnand %p564_p11, %p561_p10 }
  0x3a   :  { %569 = shalt.err (!%p566_p12)
}
  0x3b   :  { %s570_s1 = scalar_lea.vmem %s700_s30, 1024  ;;  %p575_p0 = scmp.lt.s32.totalorder %s700_s30, %s700_s30 }
  0x3c   :  { %p571_p13 = scmp.ne.s32.totalorder %s700_s30, %s570_s1  ;;  %p576_p1 = scmp.lt.s32.totalorder %s570_s1, %s570_s1 }
  0x3e   :  { %p577_p2 = por %p576_p1, %p575_p0 }
  0x40   :  { %p578_p3 = pnand %p577_p2, %p571_p13 }
  0x42   :  { %581 = shalt.err (!%p578_p3)
}
  0x43   :  { %67 = dma.hbm_to_vmem [thread:$0]  %s766_s5, 1024, %s700_s30, [#allocation10], %s614_s13, %s614_s13, %s615_s14  }
  0x44   :  { %604 = dma.done.wait [#allocation4], 128  }
  0x45   :  { %605 = vsyncadd [#allocation4], 4294967168 }
  0x46   :  { %606 = dma.done.wait [#allocation7], 512  }
  0x47   :  { %607 = vsyncadd [#allocation7], 4294966784 }
  0x48   :  { %608 = dma.done.wait [#allocation10], 1024  }
  0x49   :  { %609 = vsyncadd [#allocation10], 4294966272  ;;  %v618_v0 = vmov 0.0   ;;  %vm619_vm0 = vmmov 0   ;;  %v473_v1 = vld [vmem:[#allocation6] sm:$0xff]   ;;  %v474_v2 = vld [vmem:[#allocation6 + $0x8] sm:$0xff]  }
  0x4a   :  { %426 = vmatprep.subr.bf16.mxu1 %v618_v0  ;;  %430 = vmatprep.mubr.msk.bf16.mxu1 %vm619_vm0, %v618_v0  ;;  %v475_v3 = vld [vmem:[#allocation3] sm:$0xff]   ;;  %vm119_vm1 = vcmask 261120   ;;  %v476_v4 = vld [vmem:[#allocation8] sm:$0xff]   ;;  %v478_v6 = vld [vmem:[#allocation9] sm:$0xff]   ;;  %s620_s29 = smov [#allocation11]  }
  0x4b   :  { %442 = vmatprep.subr.bf16.mxu0 %v618_v0  ;;  %458 = vmatprep.mubr.msk.bf16.mxu0 %vm619_vm0, %v618_v0  ;;  %v477_v5 = vld [vmem:[#allocation8 + $0x8] sm:$0xff]   ;;  %v479_v7 = vld [vmem:[#allocation9 + $0x8] sm:$0xff]   ;;  %v480_v8 = vld [vmem:[#allocation9 + $0x10] sm:$0xff]   ;;  %s377_s30 = sshll.u32 %s620_s29, 4  ;;  %s378_s30 = int_to_ptr.vmem [resolvable:$true] %s377_s30 }
  0x4c   :  { %427 = vmatpush3.bf16.msra.mxu1 %v473_v1  ;;  %443 = vmatpush3.bf16.msra.mxu0 %v478_v6  ;;  %v481_v9 = vld [vmem:[#allocation9 + $0x18] sm:$0xff]   ;;  %v482_v10 = vld [vmem:[#allocation9 + $0x20] sm:$0xff]   ;;  %v483_v11 = vld [vmem:[#allocation9 + $0x28] sm:$0xff]   ;;  %p587_p5 = scmp.lt.s32.totalorder %s378_s30, %s378_s30 }
  0x4d   :  { %428 = vmatprep.subr.bf16.mxu1 %v618_v0  ;;  %444 = vmatprep.subr.bf16.mxu0 %v618_v0  ;;  %v484_v12 = vld [vmem:[#allocation9 + $0x30] sm:$0xff]   ;;  %v485_v13 = vld [vmem:[#allocation9 + $0x38] sm:$0xff]  }
  0x4e   :  { %v396_v18 = vld [vmem:[%s765_s4] ss:$0 sm:$0xff] }
  0x4f   :  { %v391_v31 = vld [vmem:[%s764_s3] ss:$0 sm:$0xff]  ;;  %s582_s3 = scalar_lea.vmem %s378_s30, 256 }
  0x50   :  { %429 = vmatpush3.bf16.msra.mxu1 %v474_v2  ;;  %445 = vmatpush3.bf16.msra.mxu0 %v479_v7  ;;  %v410_v41 = vld [vmem:[%s767_s6] ss:$0 sm:$0xff]  ;;  %p583_p4 = scmp.ne.s32.totalorder %s378_s30, %s582_s3  ;;  %p588_p6 = scmp.lt.s32.totalorder %s582_s3, %s582_s3 }
  0x51   :  { %434 = vmatprep.subr.bf16.mxu1 %v618_v0  ;;  %446 = vmatprep.subr.bf16.mxu0 %v618_v0 }
  0x52   :  { %p589_p7 = por %p588_p6, %p587_p5 }
  0x53   :  { %431 = vmatmul.mubr.msk.bf16.vlgmr.msra.gmra.mrb[0].mxu1 %vm119_vm1, %v475_v3 }
  0x54   :  { %435 = vmatpush3.bf16.msra.mxu1 %v476_v4  ;;  %438 = vmatprep.mubr.msk.bf16.mxu1 %vm619_vm0, %v618_v0  ;;  %p590_p8 = pnand %p589_p7, %p583_p4 }
  0x55   :  { %436 = vmatprep.subr.bf16.mxu1 %v618_v0  ;;  %447 = vmatpush3.bf16.msra.mxu0 %v480_v8 }
  0x56   :  { %448 = vmatprep.subr.bf16.mxu0 %v618_v0 }
  0x58   :  { %437 = vmatpush3.bf16.msra.mxu1 %v477_v5 }
  0x59   :  { %449 = vmatpush3.bf16.msra.mxu0 %v481_v9 }
  0x5a   :  { %450 = vmatprep.subr.bf16.mxu0 %v618_v0 }
  0x5b   :  { %439 = vmatmul.mubr.msk.bf16.vlgmr.msra.gmra.mrb[4].mxu1 %vm119_vm1, %v475_v3 }
  0x5d   :  { %451 = vmatpush3.bf16.msra.mxu0 %v482_v10 }
  0x5e   :  { %452 = vmatprep.subr.bf16.mxu0 %v618_v0 }
  0x61   :  { %453 = vmatpush3.bf16.msra.mxu0 %v483_v11 }
  0x62   :  { %454 = vmatprep.subr.bf16.mxu0 %v618_v0 }
  0x65   :  { %455 = vmatpush3.bf16.msra.mxu0 %v484_v12 }
  0x66   :  { %456 = vmatprep.subr.bf16.mxu0 %v618_v0 }
  0x69   :  { %457 = vmatpush3.bf16.msra.mxu0 %v485_v13 }
 0x126   :  { %v157_v14 = vpop.f32.mrb[0].mxu1 }
 0x127   :  { %v432_v15 = vpop.f32.mrb[1].mxu1  ;;  %v158_v33 = vadd.f32 %v391_v31, %v157_v14 }
 0x128   :  { %v160_v16 = vpop.f32.mrb[2].mxu1 }
 0x129   :  { %v433_v17 = vpop.f32.mrb[3].mxu1  ;;  %v161_v36 = vadd.f32 %v391_v31, %v160_v16 }
 0x12e   :  { %v221_v19 = vpop.f32.mrb[4].mxu1 }
 0x12f   :  { %v222_v20 = vadd.f32 %v396_v18, %v221_v19  ;;  %v440_v21 = vpop.f32.mrb[5].mxu1 }
 0x130   :  { %v224_v22 = vpop.f32.mrb[6].mxu1 }
 0x131   :  { %v400_v23 = vmul.f32 -1.442695, %v222_v20  ;;  %v225_v24 = vadd.f32 %v396_v18, %v224_v22  ;;  %v441_v25 = vpop.f32.mrb[7].mxu1 }
 0x133   :  { %486 = vpow2.f32 %v400_v23  ;;  %v401_v26 = vmul.f32 -1.442695, %v225_v24 }
 0x135   :  { %488 = vpow2.f32 %v401_v26 }
 0x13d   :  { %v487_v27 = vpop.eup %486 }
 0x13e   :  { %v234_v28 = vadd.f32 1.0, %v487_v27 }
 0x13f   :  { %v489_v29 = vpop.eup %488 }
 0x140   :  { %490 = vrcp.f32 %v234_v28  ;;  %v235_v30 = vadd.f32 1.0, %v489_v29 }
 0x142   :  { %492 = vrcp.f32 %v235_v30 }
 0x14a   :  { %v491_v32 = vpop.eup %490 }
 0x14b   :  { %v240_v34 = vmul.f32 %v491_v32, %v222_v20 }
 0x14c   :  { %v493_v35 = vpop.eup %492 }
 0x14d   :  { %v242_v37 = vmul.f32 %v240_v34, %v158_v33  ;;  %v241_v38 = vmul.f32 %v493_v35, %v225_v24 }
 0x14f   :  { %v243_v39 = vmul.f32 %v241_v38, %v161_v36 }
 0x151   :  { %v246_v40 = vpack.c.bf16 %v243_v39, %v242_v37 }
 0x153   :  { %459 = vmatmul.mubr.bf16.vlgmr.msra.gmra.mrb[0].mxu0 %v246_v40 }
 0x226   :  { %v345_v42 = vpop.f32.mrb[0].mxu0 }
 0x227   :  { %v368_v43 = vadd.f32 %v410_v41, %v345_v42  ;;  %v460_v44 = vpop.f32.mrb[1].mxu0 }
 0x228   :  { %v348_v45 = vpop.f32.mrb[2].mxu0 }
 0x229   :  { %370 = vst [vmem:[#allocation11] sm:$0xff] %v368_v43  ;;  %v369_v46 = vadd.f32 %v410_v41, %v348_v45  ;;  %v461_v47 = vpop.f32.mrb[3].mxu0 }
 0x22b   :  { %371 = vst [vmem:[#allocation11 + $0x8] sm:$0xff] %v369_v46 }
 0x22c   :  { %593 = shalt.err (!%p590_p8)
}
 0x22d   :  { %s594_s9 = scalar_lea.hbm %s768_s7, 256 }
 0x22e   :  { %p595_p9 = scmp.ne.s32.totalorder %s768_s7, %s594_s9  ;;  %p598_p10 = scmp.lt.u32.totalorder %s594_s9, %s768_s7 }
 0x230   :  { %p600_p11 = pnand %p598_p10, %p595_p9 }
 0x232   :  { %603 = shalt.err (!%p600_p11)
}
 0x233   :  { %s621_s16 = smov 128   ;;  %s622_s0 = smov 8  }
 0x234   :  { %383 = dma.vmem_to_hbm [thread:$0]  %s378_s30, 256, %s768_s7, [#allocation5], %s621_s16, %s621_s16, %s622_s0  }
 0x235   :  { %610 = dma.done.wait [#allocation5], 256  }
 0x236   :  { %611 = vsyncadd [#allocation5], 4294967040 }
 0x237   :  { %387 = vsyncpa [#allocation4], 1 }
 0x238   :  { %388 = vsyncpa [#allocation7], 1 }
 0x239   :  { %389 = vsyncpa [#allocation10], 1 }
 0x23a   :  { %390 = vsyncpa [#allocation5], 1 }

// kernel: tpu_custom_call.1
= control target key start
LH: loop header
LB: loop body
LE: loop exit
PB: predicated region body
PF: predicated region fallthrough
CT: control target
= control target key end

     0   :  { %12 = vsyncpa [#allocation4], 0  ;;  %s761_s0 = inlined_call_operand.hbm [shape: bf16[16,32], index: 0, kind: input, shape index: {}]   ;;  %s762_s1 = inlined_call_operand.hbm [shape: bf16[32,128], index: 1, kind: input, shape index: {}]   ;;  %s763_s2 = inlined_call_operand.hbm [shape: bf16[32,128], index: 2, kind: input, shape index: {}]   ;;  %s764_s3 = inlined_call_operand.vmem [shape: f32[1,128], index: 3, kind: input, shape index: {}]   ;;  %s765_s4 = inlined_call_operand.vmem [shape: f32[1,128], index: 4, kind: input, shape index: {}]   ;;  %s766_s5 = inlined_call_operand.hbm [shape: bf16[128,128], index: 5, kind: input, shape index: {}]   ;;  %s767_s6 = inlined_call_operand.vmem [shape: f32[1,128], index: 6, kind: input, shape index: {}]   ;;  %s768_s7 = inlined_call_operand.hbm [shape: f32[16,128], index: 7, kind: output, shape index: {}]  }
   0x1   :  { %13 = vsyncpa [#allocation7], 0 }
   0x2   :  { %14 = vsyncpa [#allocation10], 0 }
   0x3   :  { %15 = vsyncpa [#allocation5], 0  ;;  %s612_s24 = smov [#allocation6]   ;;  %s613_s26 = smov [#allocation3]  }
   0x4   :  { %s33_s25 = sshll.u32 %s612_s24, 4  ;;  %s21_s27 = sshll.u32 %s613_s26, 4  ;;  %s34_s25 = int_to_ptr.vmem [resolvable:$true] %s33_s25  ;;  %s663_s27 = int_to_ptr.vmem [resolvable:$true] %s21_s27 }
   0x5   :  { %s494_s30 = scalar_lea.hbm %s762_s1, 256 }
   0x6   :  { %p495_p0 = scmp.ne.s32.totalorder %s762_s1, %s494_s30  ;;  %p498_p1 = scmp.lt.u32.totalorder %s494_s30, %s762_s1 }
   0x8   :  { %p500_p2 = pnand %p498_p1, %p495_p0 }
   0xa   :  { %503 = shalt.err (!%p500_p2)
}
   0xb   :  { %s504_s12 = scalar_lea.vmem %s34_s25, 256  ;;  %p509_p4 = scmp.lt.s32.totalorder %s34_s25, %s34_s25 }
   0xc   :  { %p505_p3 = scmp.ne.s32.totalorder %s34_s25, %s504_s12  ;;  %p510_p5 = scmp.lt.s32.totalorder %s504_s12, %s504_s12 }
   0xe   :  { %p511_p6 = por %p510_p5, %p509_p4 }
  0x10   :  { %p512_p7 = pnand %p511_p6, %p505_p3 }
  0x12   :  { %515 = shalt.err (!%p512_p7)
}
  0x13   :  { %s614_s13 = smov 64   ;;  %s615_s14 = smov 4  }
  0x14   :  { %39 = dma.hbm_to_vmem [thread:$0]  %s762_s1, 256, %s34_s25, [#allocation7], %s614_s13, %s614_s13, %s615_s14  }
  0x15   :  { %s516_s19 = scalar_lea.hbm %s761_s0, 128 }
  0x16   :  { %p517_p8 = scmp.ne.s32.totalorder %s761_s0, %s516_s19  ;;  %p520_p9 = scmp.lt.u32.totalorder %s516_s19, %s761_s0 }
  0x18   :  { %p522_p10 = pnand %p520_p9, %p517_p8 }
  0x1a   :  { %525 = shalt.err (!%p522_p10)
}
  0x1b   :  { %s526_s24 = scalar_lea.vmem %s663_s27, 128  ;;  %p531_p12 = scmp.lt.s32.totalorder %s663_s27, %s663_s27 }
  0x1c   :  { %p527_p11 = scmp.ne.s32.totalorder %s663_s27, %s526_s24  ;;  %p532_p13 = scmp.lt.s32.totalorder %s526_s24, %s526_s24 }
  0x1e   :  { %p533_p0 = por %p532_p13, %p531_p12 }
  0x20   :  { %p534_p1 = pnand %p533_p0, %p527_p11 }
  0x22   :  { %537 = shalt.err (!%p534_p1)
}
  0x23   :  { %27 = dma.hbm_to_vmem [thread:$0]  %s761_s0, 128, %s663_s27, [#allocation4], %s614_s13, %s614_s13, %s615_s14  }
  0x24   :  { %s616_s26 = smov [#allocation8]   ;;  %s617_s29 = smov [#allocation9]  }
  0x25   :  { %s45_s28 = sshll.u32 %s616_s26, 4  ;;  %s61_s30 = sshll.u32 %s617_s29, 4  ;;  %s46_s28 = int_to_ptr.vmem [resolvable:$true] %s45_s28  ;;  %s700_s30 = int_to_ptr.vmem [resolvable:$true] %s61_s30 }
  0x26   :  { %s538_s10 = scalar_lea.hbm %s763_s2, 256 }
  0x27   :  { %p539_p2 = scmp.ne.s32.totalorder %s763_s2, %s538_s10  ;;  %p542_p3 = scmp.lt.u32.totalorder %s538_s10, %s763_s2 }
  0x29   :  { %p544_p4 = pnand %p542_p3, %p539_p2 }
  0x2b   :  { %547 = shalt.err (!%p544_p4)
}
  0x2c   :  { %s548_s0 = scalar_lea.vmem %s46_s28, 256  ;;  %p553_p6 = scmp.lt.s32.totalorder %s46_s28, %s46_s28 }
  0x2d   :  { %p549_p5 = scmp.ne.s32.totalorder %s46_s28, %s548_s0  ;;  %p554_p7 = scmp.lt.s32.totalorder %s548_s0, %s548_s0 }
  0x2f   :  { %p555_p8 = por %p554_p7, %p553_p6 }
  0x31   :  { %p556_p9 = pnand %p555_p8, %p549_p5 }
  0x33   :  { %559 = shalt.err (!%p556_p9)
}
  0x34   :  { %51 = dma.hbm_to_vmem [thread:$0]  %s763_s2, 256, %s46_s28, [#allocation7], %s614_s13, %s614_s13, %s615_s14  }
  0x35   :  { %s560_s20 = scalar_lea.hbm %s766_s5, 1024 }
  0x36   :  { %p561_p10 = scmp.ne.s32.totalorder %s766_s5, %s560_s20  ;;  %p564_p11 = scmp.lt.u32.totalorder %s560_s20, %s766_s5 }
  0x38   :  { %p566_p12 = pnand %p564_p11, %p561_p10 }
  0x3a   :  { %569 = shalt.err (!%p566_p12)
}
  0x3b   :  { %s570_s1 = scalar_lea.vmem %s700_s30, 1024  ;;  %p575_p0 = scmp.lt.s32.totalorder %s700_s30, %s700_s30 }
  0x3c   :  { %p571_p13 = scmp.ne.s32.totalorder %s700_s30, %s570_s1  ;;  %p576_p1 = scmp.lt.s32.totalorder %s570_s1, %s570_s1 }
  0x3e   :  { %p577_p2 = por %p576_p1, %p575_p0 }
  0x40   :  { %p578_p3 = pnand %p577_p2, %p571_p13 }
  0x42   :  { %581 = shalt.err (!%p578_p3)
}
  0x43   :  { %67 = dma.hbm_to_vmem [thread:$0]  %s766_s5, 1024, %s700_s30, [#allocation10], %s614_s13, %s614_s13, %s615_s14  }
  0x44   :  { %604 = dma.done.wait [#allocation4], 128  }
  0x45   :  { %605 = vsyncadd [#allocation4], 4294967168 }
  0x46   :  { %606 = dma.done.wait [#allocation7], 512  }
  0x47   :  { %607 = vsyncadd [#allocation7], 4294966784 }
  0x48   :  { %608 = dma.done.wait [#allocation10], 1024  }
  0x49   :  { %609 = vsyncadd [#allocation10], 4294966272  ;;  %v618_v0 = vmov 0.0   ;;  %vm619_vm0 = vmmov 0   ;;  %v473_v1 = vld [vmem:[#allocation6] sm:$0xff]   ;;  %v474_v2 = vld [vmem:[#allocation6 + $0x8] sm:$0xff]  }
  0x4a   :  { %426 = vmatprep.subr.bf16.mxu1 %v618_v0  ;;  %430 = vmatprep.mubr.msk.bf16.mxu1 %vm619_vm0, %v618_v0  ;;  %v475_v3 = vld [vmem:[#allocation3] sm:$0xff]   ;;  %vm119_vm1 = vcmask 261120   ;;  %v476_v4 = vld [vmem:[#allocation8] sm:$0xff]   ;;  %v478_v6 = vld [vmem:[#allocation9] sm:$0xff]   ;;  %s620_s29 = smov [#allocation11]  }
  0x4b   :  { %442 = vmatprep.subr.bf16.mxu0 %v618_v0  ;;  %458 = vmatprep.mubr.msk.bf16.mxu0 %vm619_vm0, %v618_v0  ;;  %v477_v5 = vld [vmem:[#allocation8 + $0x8] sm:$0xff]   ;;  %v479_v7 = vld [vmem:[#allocation9 + $0x8] sm:$0xff]   ;;  %v480_v8 = vld [vmem:[#allocation9 + $0x10] sm:$0xff]   ;;  %s377_s30 = sshll.u32 %s620_s29, 4  ;;  %s378_s30 = int_to_ptr.vmem [resolvable:$true] %s377_s30 }
  0x4c   :  { %427 = vmatpush3.bf16.msra.mxu1 %v473_v1  ;;  %443 = vmatpush3.bf16.msra.mxu0 %v478_v6  ;;  %v481_v9 = vld [vmem:[#allocation9 + $0x18] sm:$0xff]   ;;  %v482_v10 = vld [vmem:[#allocation9 + $0x20] sm:$0xff]   ;;  %v483_v11 = vld [vmem:[#allocation9 + $0x28] sm:$0xff]   ;;  %p587_p5 = scmp.lt.s32.totalorder %s378_s30, %s378_s30 }
  0x4d   :  { %428 = vmatprep.subr.bf16.mxu1 %v618_v0  ;;  %444 = vmatprep.subr.bf16.mxu0 %v618_v0  ;;  %v484_v12 = vld [vmem:[#allocation9 + $0x30] sm:$0xff]   ;;  %v485_v13 = vld [vmem:[#allocation9 + $0x38] sm:$0xff]  }
  0x4e   :  { %v396_v18 = vld [vmem:[%s765_s4] ss:$0 sm:$0xff] }
  0x4f   :  { %v391_v31 = vld [vmem:[%s764_s3] ss:$0 sm:$0xff]  ;;  %s582_s3 = scalar_lea.vmem %s378_s30, 256 }
  0x50   :  { %429 = vmatpush3.bf16.msra.mxu1 %v474_v2  ;;  %445 = vmatpush3.bf16.msra.mxu0 %v479_v7  ;;  %v410_v41 = vld [vmem:[%s767_s6] ss:$0 sm:$0xff]  ;;  %p583_p4 = scmp.ne.s32.totalorder %s378_s30, %s582_s3  ;;  %p588_p6 = scmp.lt.s32.totalorder %s582_s3, %s582_s3 }
  0x51   :  { %434 = vmatprep.subr.bf16.mxu1 %v618_v0  ;;  %446 = vmatprep.subr.bf16.mxu0 %v618_v0 }
  0x52   :  { %p589_p7 = por %p588_p6, %p587_p5 }
  0x53   :  { %431 = vmatmul.mubr.msk.bf16.vlgmr.msra.gmra.mrb[0].mxu1 %vm119_vm1, %v475_v3 }
  0x54   :  { %435 = vmatpush3.bf16.msra.mxu1 %v476_v4  ;;  %438 = vmatprep.mubr.msk.bf16.mxu1 %vm619_vm0, %v618_v0  ;;  %p590_p8 = pnand %p589_p7, %p583_p4 }
  0x55   :  { %436 = vmatprep.subr.bf16.mxu1 %v618_v0  ;;  %447 = vmatpush3.bf16.msra.mxu0 %v480_v8 }
  0x56   :  { %448 = vmatprep.subr.bf16.mxu0 %v618_v0 }
  0x58   :  { %437 = vmatpush3.bf16.msra.mxu1 %v477_v5 }
  0x59   :  { %449 = vmatpush3.bf16.msra.mxu0 %v481_v9 }
  0x5a   :  { %450 = vmatprep.subr.bf16.mxu0 %v618_v0 }
  0x5b   :  { %439 = vmatmul.mubr.msk.bf16.vlgmr.msra.gmra.mrb[4].mxu1 %vm119_vm1, %v475_v3 }
  0x5d   :  { %451 = vmatpush3.bf16.msra.mxu0 %v482_v10 }
  0x5e   :  { %452 = vmatprep.subr.bf16.mxu0 %v618_v0 }
  0x61   :  { %453 = vmatpush3.bf16.msra.mxu0 %v483_v11 }
  0x62   :  { %454 = vmatprep.subr.bf16.mxu0 %v618_v0 }
  0x65   :  { %455 = vmatpush3.bf16.msra.mxu0 %v484_v12 }
  0x66   :  { %456 = vmatprep.subr.bf16.mxu0 %v618_v0 }
  0x69   :  { %457 = vmatpush3.bf16.msra.mxu0 %v485_v13 }
 0x126   :  { %v157_v14 = vpop.f32.mrb[0].mxu1 }
 0x127   :  { %v432_v15 = vpop.f32.mrb[1].mxu1  ;;  %v158_v33 = vadd.f32 %v391_v31, %v157_v14 }
 0x128   :  { %v160_v16 = vpop.f32.mrb[2].mxu1 }
 0x129   :  { %v433_v17 = vpop.f32.mrb[3].mxu1  ;;  %v161_v36 = vadd.f32 %v391_v31, %v160_v16 }
 0x12e   :  { %v221_v19 = vpop.f32.mrb[4].mxu1 }
 0x12f   :  { %v222_v20 = vadd.f32 %v396_v18, %v221_v19  ;;  %v440_v21 = vpop.f32.mrb[5].mxu1 }
 0x130   :  { %v224_v22 = vpop.f32.mrb[6].mxu1 }
 0x131   :  { %v400_v23 = vmul.f32 -1.442695, %v222_v20  ;;  %v225_v24 = vadd.f32 %v396_v18, %v224_v22  ;;  %v441_v25 = vpop.f32.mrb[7].mxu1 }
 0x133   :  { %486 = vpow2.f32 %v400_v23  ;;  %v401_v26 = vmul.f32 -1.442695, %v225_v24 }
 0x135   :  { %488 = vpow2.f32 %v401_v26 }
 0x13d   :  { %v487_v27 = vpop.eup %486 }
 0x13e   :  { %v234_v28 = vadd.f32 1.0, %v487_v27 }
 0x13f   :  { %v489_v29 = vpop.eup %488 }
 0x140   :  { %490 = vrcp.f32 %v234_v28  ;;  %v235_v30 = vadd.f32 1.0, %v489_v29 }
 0x142   :  { %492 = vrcp.f32 %v235_v30 }
 0x14a   :  { %v491_v32 = vpop.eup %490 }
 0x14b   :  { %v240_v34 = vmul.f32 %v491_v32, %v222_v20 }
 0x14c   :  { %v493_v35 = vpop.eup %492 }
 0x14d   :  { %v242_v37 = vmul.f32 %v240_v34, %v158_v33  ;;  %v241_v38 = vmul.f32 %v493_v35, %v225_v24 }
 0x14f   :  { %v243_v39 = vmul.f32 %v241_v38, %v161_v36 }
 0x151   :  { %v246_v40 = vpack.c.bf16 %v243_v39, %v242_v37 }
 0x153   :  { %459 = vmatmul.mubr.bf16.vlgmr.msra.gmra.mrb[0].mxu0 %v246_v40 }
 0x226   :  { %v345_v42 = vpop.f32.mrb[0].mxu0 }
 0x227   :  { %v368_v43 = vadd.f32 %v410_v41, %v345_v42  ;;  %v460_v44 = vpop.f32.mrb[1].mxu0 }
 0x228   :  { %v348_v45 = vpop.f32.mrb[2].mxu0 }
 0x229   :  { %370 = vst [vmem:[#allocation11] sm:$0xff] %v368_v43  ;;  %v369_v46 = vadd.f32 %v410_v41, %v348_v45  ;;  %v461_v47 = vpop.f32.mrb[3].mxu0 }
 0x22b   :  { %371 = vst [vmem:[#allocation11 + $0x8] sm:$0xff] %v369_v46 }
 0x22c   :  { %593 = shalt.err (!%p590_p8)
}
 0x22d   :  { %s594_s9 = scalar_lea.hbm %s768_s7, 256 }
 0x22e   :  { %p595_p9 = scmp.ne.s32.totalorder %s768_s7, %s594_s9  ;;  %p598_p10 = scmp.lt.u32.totalorder %s594_s9, %s768_s7 }
 0x230   :  { %p600_p11 = pnand %p598_p10, %p595_p9 }
 0x232   :  { %603 = shalt.err (!%p600_p11)
}
 0x233   :  { %s621_s16 = smov 128   ;;  %s622_s0 = smov 8  }
 0x234   :  { %383 = dma.vmem_to_hbm [thread:$0]  %s378_s30, 256, %s768_s7, [#allocation5], %s621_s16, %s621_s16, %s622_s0  }
 0x235   :  { %610 = dma.done.wait [#allocation5], 256  }
 0x236   :  { %611 = vsyncadd [#allocation5], 4294967040 }
 0x237   :  { %387 = vsyncpa [#allocation4], 1 }
 0x238   :  { %388 = vsyncpa [#allocation7], 1 }
 0x239   :  { %389 = vsyncpa [#allocation10], 1 }
 0x23a   :  { %390 = vsyncpa [#allocation5], 1 }

</bundles_post_ra>
